<compile_context>
chip_gen: v7x
topology: tpu7x:2x2x1
jax: 0.10.0
libtpu: 0.0.40
codegen_flags: <defaults>
</compile_context>

<pallas_src>
import functools

import jax
import jax.numpy as jnp
from jax.experimental import pallas as pl
from jax.experimental.pallas import tpu as pltpu

NEG_SLOPE = 0.01        # F.leaky_relu default negative_slope
M_INIT = -3e38          # finite "-inf" sentinel for the running max


def _pick_tile(n):
    """Largest convenient tile that divides n (full n if nothing divides)."""
    for t in (512, 256, 128):
        if n % t == 0:
            return t
    return n


# ----------------------------------------------------------------------------
# Kernel A: head-batched fc + folded attention projections.
#   x_ref  : [TN, Din]
#   wz_ref : [Din, H*Dout]    (pre-transposed, heads concatenated along lanes)
#   wp_ref : [Din, 2H]        (cols 0..H-1 -> src proj, cols H..2H-1 -> dst proj)
# outputs:
#   z_ref    : [TN, H*Dout]   lane-dense z for all heads
#   sdst_ref : [TN, H]        per-dst-node attention scores (node-major)
#   ssrc_ref : [H, TN]        per-src-node attention scores (head-major row layout,
#                             so kernel B broadcasts it without a transpose)
# ----------------------------------------------------------------------------
def gat_fc_kernel(x_ref, wz_ref, wp_ref, z_ref, sdst_ref, ssrc_ref, *, num_heads):
    x = x_ref[...]
    z_ref[...] = jnp.dot(x, wz_ref[...], preferred_element_type=jnp.float32)
    s = jnp.dot(x, wp_ref[...], preferred_element_type=jnp.float32)   # [TN, 2H]
    sdst_ref[...] = s[:, num_heads:]
    ssrc_ref[...] = s[:, :num_heads].T                                 # tiny [TN,H] transpose


# ----------------------------------------------------------------------------
# Kernel B: flash-style masked attention + aggregation for all heads.
# grid = (N // TQ, N // TK); src-tile axis (ki) is the reduction axis.
#   z_ref    : [TK, H*Dout]   src-node z (all heads)
#   sdst_ref : [TQ, H]
#   ssrc_ref : [H, TK]
#   bias_ref : [TQ, TK]       bf16 additive mask (0 keep / -inf drop)
#   o_ref    : [TQ, H*Dout]   lane-dense output (resident across ki)
# scratch: running max m [TQ,H], denom l [TQ,H], numerator acc [TQ,H*Dout]
# ----------------------------------------------------------------------------
def gat_attn_kernel(z_ref, sdst_ref, ssrc_ref, bias_ref, o_ref,
                    m_ref, l_ref, acc_ref, *, num_heads, out_dim):
    ki = pl.program_id(1)

    @pl.when(ki == 0)
    def _init():
        m_ref[...] = jnp.full(m_ref.shape, M_INIT, jnp.float32)
        l_ref[...] = jnp.zeros(l_ref.shape, jnp.float32)
        acc_ref[...] = jnp.zeros(acc_ref.shape, jnp.float32)

    z = z_ref[...]                                   # [TK, H*Dout]
    s_dst = sdst_ref[...]                            # [TQ, H]
    s_src = ssrc_ref[...]                            # [H, TK]
    bias = bias_ref[...].astype(jnp.float32)         # upcast once, shared by all heads

    for h in range(num_heads):                       # H is small & static
        lo, hi = h * out_dim, (h + 1) * out_dim
        logits = s_dst[:, h:h + 1] + s_src[h:h + 1, :]            # [TQ, TK]
        e = jnp.maximum(logits, NEG_SLOPE * logits) + bias        # leaky_relu + mask

        m_old = m_ref[:, h:h + 1]
        m_new = jnp.maximum(m_old, jnp.max(e, axis=1, keepdims=True))
        c = jnp.exp(m_old - m_new)                                 # rescale factor
        p = jnp.exp(e - m_new)                                     # masked -> exact 0

        l_ref[:, h:h + 1] = c * l_ref[:, h:h + 1] + jnp.sum(p, axis=1, keepdims=True)
        acc_ref[:, lo:hi] = c * acc_ref[:, lo:hi] + jnp.dot(
            p, z[:, lo:hi], preferred_element_type=jnp.float32)
        m_ref[:, h:h + 1] = m_new

    @pl.when(ki == pl.num_programs(1) - 1)
    def _final():
        inv_l = pl.reciprocal(l_ref[...], approx=True)             # EUP, ~free
        for h in range(num_heads):
            lo, hi = h * out_dim, (h + 1) * out_dim
            o_ref[:, lo:hi] = acc_ref[:, lo:hi] * inv_l[:, h:h + 1]


# ----------------------------------------------------------------------------
# Wrapper
# ----------------------------------------------------------------------------
def multi_head_gat(h, W, a, adj, merge="cat"):
    """h: [N, Din], W: [H, Dout, Din], a: [H, 2*Dout] (attn_fc weight), adj: [N, N]."""
    H_, Dout, Din = W.shape
    N = h.shape[0]

    a_src = a[:, :Dout]                                  # [H, Dout]
    a_dst = a[:, Dout:]                                  # [H, Dout]

    # Head-batched, pre-transposed fc weight: z_all[:, h*Dout+o] = (h @ W[h].T)[:, o]
    Wz = jnp.transpose(W, (2, 0, 1)).reshape(Din, H_ * Dout)        # [Din, H*Dout]
    # Fold attention projections into the fc:  s_src = h @ (W^T a_src), s_dst likewise.
    proj_src = jnp.einsum("ho,hod->hd", a_src, W)                   # [H, Din]
    proj_dst = jnp.einsum("ho,hod->hd", a_dst, W)                   # [H, Din]
    Wp = jnp.concatenate([proj_src.T, proj_dst.T], axis=1)          # [Din, 2H]

    # Additive mask bias (0 keep / -inf drop), bf16 to halve HBM/VMEM bytes.
    bias = jnp.where(adj > 0, 0.0, -jnp.inf).astype(jnp.bfloat16)   # [N, N]

    cparams = pltpu.CompilerParams(
        dimension_semantics=("parallel",),
        vmem_limit_bytes=48 * 1024 * 1024,       # headroom under v7x 64 MiB VMEM
    )

    tn = _pick_tile(N)
    z_all, s_dst, s_src = pl.pallas_call(
        functools.partial(gat_fc_kernel, num_heads=H_),
        out_shape=(
            jax.ShapeDtypeStruct((N, H_ * Dout), jnp.float32),
            jax.ShapeDtypeStruct((N, H_), jnp.float32),
            jax.ShapeDtypeStruct((H_, N), jnp.float32),
        ),
        grid_spec=pltpu.PrefetchScalarGridSpec(
            num_scalar_prefetch=0,
            grid=(N // tn,),
            in_specs=[
                pl.BlockSpec((tn, Din), lambda i: (i, 0)),
                pl.BlockSpec((Din, H_ * Dout), lambda i: (0, 0)),
                pl.BlockSpec((Din, 2 * H_), lambda i: (0, 0)),
            ],
            out_specs=(
                pl.BlockSpec((tn, H_ * Dout), lambda i: (i, 0)),
                pl.BlockSpec((tn, H_), lambda i: (i, 0)),
                pl.BlockSpec((H_, tn), lambda i: (0, i)),
            ),
        ),
        compiler_params=cparams,
    )(h, Wz, Wp)

    tq = _pick_tile(N)
    tk = _pick_tile(N)
    out = pl.pallas_call(
        functools.partial(gat_attn_kernel, num_heads=H_, out_dim=Dout),
        out_shape=jax.ShapeDtypeStruct((N, H_ * Dout), jnp.float32),
        grid_spec=pltpu.PrefetchScalarGridSpec(
            num_scalar_prefetch=0,
            grid=(N // tq, N // tk),
            in_specs=[
                pl.BlockSpec((tk, H_ * Dout), lambda qi, ki: (ki, 0)),   # src z
                pl.BlockSpec((tq, H_), lambda qi, ki: (qi, 0)),          # dst scores
                pl.BlockSpec((H_, tk), lambda qi, ki: (0, ki)),          # src scores (row layout)
                pl.BlockSpec((tq, tk), lambda qi, ki: (qi, ki)),         # mask bias
            ],
            out_specs=pl.BlockSpec((tq, H_ * Dout), lambda qi, ki: (qi, 0)),
            scratch_shapes=[
                pltpu.VMEM((tq, H_), jnp.float32),            # running max
                pltpu.VMEM((tq, H_), jnp.float32),            # running denom
                pltpu.VMEM((tq, H_ * Dout), jnp.float32),     # running numerator
            ],
        ),
        compiler_params=pltpu.CompilerParams(
            dimension_semantics=("parallel", "arbitrary"),
            vmem_limit_bytes=48 * 1024 * 1024,
        ),
    )(z_all, s_dst, s_src, bias)

    if merge == "cat":
        # Already lane-dense [N, H*Dout] with head 0 first == torch.cat(head_outs, dim=1)
        return out
    # Mirrors the DGL tutorial's `torch.mean(torch.stack(head_outs))` -> scalar
    # (mean over every element, not per-head averaging).
    return jnp.mean(out)


# ----------------------------------------------------------------------------
# Pure-JAX reference mirroring the PyTorch/DGL semantics (dense graph).
# ----------------------------------------------------------------------------
def ref_multi_head_gat(h, W, a, adj, merge="cat"):
    H_, Dout, _ = W.shape
    outs = []
    for i in range(H_):
        z = h @ W[i].T
        s_src = z @ a[i, :Dout]
        s_dst = z @ a[i, Dout:]
        e = s_dst[:, None] + s_src[None, :]
        e = jnp.where(e > 0, e, NEG_SLOPE * e)
        e = jnp.where(adj > 0, e, -jnp.inf)
        alpha = jax.nn.softmax(e, axis=1)
        outs.append(alpha @ z)
    if merge == "cat":
        return jnp.concatenate(outs, axis=1)
    return jnp.mean(jnp.stack(outs))


if __name__ == "__main__":
    N, IN_DIM, OUT_DIM, NUM_HEADS = 16, 8, 8, 4

    key = jax.random.PRNGKey(0)
    k_h, k_w, k_a = jax.random.split(key, 3)

    h = jax.random.normal(k_h, (N, IN_DIM), dtype=jnp.float32)
    W = jax.random.normal(k_w, (NUM_HEADS, OUT_DIM, IN_DIM), dtype=jnp.float32) * 0.2
    a = jax.random.normal(k_a, (NUM_HEADS, 2 * OUT_DIM), dtype=jnp.float32) * 0.2

    # Synthetic graph: self-loops + bidirectional ring (every node has >=1 in-edge).
    adj = jnp.eye(N, dtype=jnp.float32)
    idx = jnp.arange(N)
    adj = adj.at[idx, (idx + 1) % N].set(1.0)
    adj = adj.at[idx, (idx - 1) % N].set(1.0)

    out = multi_head_gat(h, W, a, adj, merge="cat")
    out = jax.block_until_ready(out)

    ref = ref_multi_head_gat(h, W, a, adj, merge="cat")
    assert out.shape == (N, NUM_HEADS * OUT_DIM), out.shape
    # tolerance relaxed slightly for the EUP approx reciprocal in the softmax norm
    assert jnp.allclose(out, ref, atol=2e-3, rtol=2e-3), float(jnp.max(jnp.abs(out - ref)))

    print("KERNEL_OK")
</pallas_src>

<mosaic_0001>
module attributes {stable_mosaic.version = 11 : i64} {
  func.func @gat_fc_kernel(%arg0: i32, %arg1: memref<16x8xf32, #tpu.memory_space<vmem>>, %arg2: memref<8x32xf32, #tpu.memory_space<vmem>>, %arg3: memref<8x8xf32, #tpu.memory_space<vmem>>, %arg4: memref<16x32xf32, #tpu.memory_space<vmem>>, %arg5: memref<16x4xf32, #tpu.memory_space<vmem>>, %arg6: memref<4x16xf32, #tpu.memory_space<vmem>>) attributes {dimension_semantics = [#tpu.dimension_semantics<parallel>], iteration_bounds = array<i64: 1>, scalar_prefetch = 0 : i64, scratch_operands = 0 : i64, tpu.core_type = #tpu.core_type<tc>, window_params = [{transform_indices = @transform_0, window_bounds = array<i64: 16, 8>}, {pipeline_mode = #tpu.pipeline_mode<synchronous>, transform_indices = @transform_1, window_bounds = array<i64: 8, 32>}, {pipeline_mode = #tpu.pipeline_mode<synchronous>, transform_indices = @transform_2, window_bounds = array<i64: 8, 8>}, {transform_indices = @transform_3, window_bounds = array<i64: 16, 32>}, {transform_indices = @transform_4, window_bounds = array<i64: 16, 4>}, {transform_indices = @transform_5, window_bounds = array<i64: 4, 16>}]} {
    %c0 = arith.constant 0 : index
    %c0_0 = arith.constant 0 : index
    %0 = vector.load %arg1[%c0, %c0_0] : memref<16x8xf32, #tpu.memory_space<vmem>>, vector<16x8xf32>
    %c0_1 = arith.constant 0 : index
    %c0_2 = arith.constant 0 : index
    %1 = vector.load %arg2[%c0_1, %c0_2] : memref<8x32xf32, #tpu.memory_space<vmem>>, vector<8x32xf32>
    %cst = arith.constant dense<0.000000e+00> : vector<16x32xf32>
    %2 = tpu.matmul %0, %1, %cst {dimension_numbers = #tpu.dot_dimension_numbers<[1], [0], [0], [1], [0, 0, 1, 1], [], []>} : vector<16x8xf32>, vector<8x32xf32>, vector<16x32xf32> -> vector<16x32xf32>
    %c0_3 = arith.constant 0 : index
    %c0_4 = arith.constant 0 : index
    %3 = vector.load %arg4[%c0_3, %c0_4] : memref<16x32xf32, #tpu.memory_space<vmem>>, vector<16x32xf32>
    tpu.vector_store %arg4[%c0_3, %c0_4], %2 {strides = array<i32>} : memref<16x32xf32, #tpu.memory_space<vmem>>, vector<16x32xf32>,
    %c0_5 = arith.constant 0 : index
    %c0_6 = arith.constant 0 : index
    %4 = vector.load %arg3[%c0_5, %c0_6] : memref<8x8xf32, #tpu.memory_space<vmem>>, vector<8x8xf32>
    %cst_7 = arith.constant dense<0.000000e+00> : vector<16x8xf32>
    %5 = tpu.matmul %0, %4, %cst_7 {dimension_numbers = #tpu.dot_dimension_numbers<[1], [0], [0], [1], [0, 0, 1, 1], [], []>} : vector<16x8xf32>, vector<8x8xf32>, vector<16x8xf32> -> vector<16x8xf32>
    %6 = vector.extract_strided_slice %5 {offsets = [0, 4], sizes = [16, 4], strides = [1, 1]} : vector<16x8xf32> to vector<16x4xf32>
    %c0_8 = arith.constant 0 : index
    %c0_9 = arith.constant 0 : index
    %7 = vector.load %arg5[%c0_8, %c0_9] : memref<16x4xf32, #tpu.memory_space<vmem>>, vector<16x4xf32>
    tpu.vector_store %arg5[%c0_8, %c0_9], %6 {strides = array<i32>} : memref<16x4xf32, #tpu.memory_space<vmem>>, vector<16x4xf32>,
    %8 = vector.extract_strided_slice %5 {offsets = [0, 0], sizes = [16, 4], strides = [1, 1]} : vector<16x8xf32> to vector<16x4xf32>
    %9 = tpu.transpose %8, [1, 0] : vector<16x4xf32> -> vector<4x16xf32>
    %c0_10 = arith.constant 0 : index
    %c0_11 = arith.constant 0 : index
    %10 = vector.load %arg6[%c0_10, %c0_11] : memref<4x16xf32, #tpu.memory_space<vmem>>, vector<4x16xf32>
    tpu.vector_store %arg6[%c0_10, %c0_11], %9 {strides = array<i32>} : memref<4x16xf32, #tpu.memory_space<vmem>>, vector<4x16xf32>,
    return
  }
  func.func @transform_0(%arg0: i32) -> (i32, i32) {
    %c0_i32 = arith.constant 0 : i32
    %c0_i32_0 = arith.constant 0 : i32
    return %arg0, %c0_i32 : i32, i32
  }
  func.func @transform_1(%arg0: i32) -> (i32, i32) {
    %c0_i32 = arith.constant 0 : i32
    %c0_i32_0 = arith.constant 0 : i32
    %c0_i32_1 = arith.constant 0 : i32
    return %c0_i32, %c0_i32_0 : i32, i32
  }
  func.func @transform_2(%arg0: i32) -> (i32, i32) {
    %c0_i32 = arith.constant 0 : i32
    %c0_i32_0 = arith.constant 0 : i32
    %c0_i32_1 = arith.constant 0 : i32
    return %c0_i32, %c0_i32_0 : i32, i32
  }
  func.func @transform_3(%arg0: i32) -> (i32, i32) {
    %c0_i32 = arith.constant 0 : i32
    %c0_i32_0 = arith.constant 0 : i32
    return %arg0, %c0_i32 : i32, i32
  }
  func.func @transform_4(%arg0: i32) -> (i32, i32) {
    %c0_i32 = arith.constant 0 : i32
    %c0_i32_0 = arith.constant 0 : i32
    return %arg0, %c0_i32 : i32, i32
  }
  func.func @transform_5(%arg0: i32) -> (i32, i32) {
    %c0_i32 = arith.constant 0 : i32
    %c0_i32_0 = arith.constant 0 : i32
    return %c0_i32, %arg0 : i32, i32
  }
}

</mosaic_0001>

<bundles_post_ra>
// kernel: tpu_custom_call.1
= control target key start
LH: loop header
LB: loop body
LE: loop exit
PB: predicated region body
PF: predicated region fallthrough
CT: control target
= control target key end

     0   :  { %11 = vsyncpa [#allocation3], 0  ;;  %vm22_vm0 = vcmask 64512   ;;  %s413_s0 = inlined_call_operand.vmem [shape: f32[16,8], index: 0, kind: input, shape index: {}]   ;;  %s414_s1 = inlined_call_operand.vmem [shape: f32[8,32], index: 1, kind: input, shape index: {}]   ;;  %s415_s2 = inlined_call_operand.vmem [shape: f32[8,8], index: 2, kind: input, shape index: {}]   ;;  %s416_s3 = inlined_call_operand.hbm [shape: f32[16,32], index: 3, kind: output, shape index: {0}]   ;;  %s417_s4 = inlined_call_operand.vmem [shape: f32[16,4], index: 4, kind: output, shape index: {1}]   ;;  %s418_s5 = inlined_call_operand.hbm [shape: f32[4,16], index: 5, kind: output, shape index: {2}]  }
   0x1   :  { %v107_v0 = vld [vmem:[%s415_s2] sm:$0xff]  ;;  %v20_v2 = vld [vmem:[%s413_s0 + $0x8] sm:$0xff] }
   0x2   :  { %v19_v1 = vld [vmem:[%s413_s0] sm:$0xff]  ;;  %277 = vmatprep.subr.mxu1 %v107_v0 }
   0x3   :  { %279 = vmatprep.mubr.msk.f32.mxu1 %vm22_vm0, %v19_v1  ;;  %v21_v3 = vld [vmem:[%s414_s1] sm:$0xff] }
   0x4   :  { %12 = vsyncpa [#allocation5], 0  ;;  %278 = vmatpush3.msra.mxu1 %v107_v0  ;;  %272 = vmatprep.subr.mxu0 %v21_v3  ;;  %vm104_vm1 = vcmask 261120   ;;  %s336_s2 = smov 124   ;;  %s337_s0 = smov [#allocation2]  }
   0x5   :  { %280 = vmatmul.mubr.msk.f32.vlgmr.msra.gmra.mrb[0].mxu1 %vm22_vm0, %v20_v2  ;;  %273 = vmatpush3.msra.mxu0 %v21_v3  ;;  %s233_s26 = sshll.u32 %s337_s0, 4  ;;  %s234_s26 = int_to_ptr.vmem [resolvable:$true] %s233_s26 }
   0x6   :  { %274 = vmatprep.mubr.msk.f32.mxu0 %vm22_vm0, %v19_v1  ;;  %s288_s1 = scalar_lea.vmem %s234_s26, 256  ;;  %p293_p1 = scmp.lt.s32.totalorder %s234_s26, %s234_s26 }
   0x7   :  { %275 = vmatmul.mubr.msk.f32.vlgmr.msra.gmra.mrb[0].mxu0 %vm22_vm0, %v20_v2  ;;  %p289_p0 = scmp.ne.s32.totalorder %s234_s26, %s288_s1  ;;  %p294_p2 = scmp.lt.s32.totalorder %s288_s1, %s288_s1 }
   0x9   :  { %p295_p3 = por %p294_p2, %p293_p1 }
   0xb   :  { %p296_p4 = pnand %p295_p3, %p289_p0 }
  0xd8   :  { %v281_v4 = vpop.f32.mrb[0].mxu1 }
  0xd9   :  { %v174_v5 = vpop.f32.mrb[1].mxu1 }
  0xda   :  { %194 = vxpose.xlu1.b32.start [1/2] (short) (narrow) %v174_v5, 8  ;;  %185 = vrot.lane.b32.xlu0 %v174_v5, %s336_s2  ;;  %v276_v6 = vpop.f32.mrb[0].mxu0 }
  0xdb   :  { %106 = vst.msk [vmem:[#allocation2 + $0x8] sm:$0xff] %vm104_vm1, %v276_v6  ;;  %v95_v7 = vpop.f32.mrb[1].mxu0 }
  0xdc   :  { %105 = vst.msk [vmem:[#allocation2] sm:$0xff] %vm104_vm1, %v95_v7 }
  0xdd   :  { %299 = shalt.err (!%p296_p4)
}
  0xde   :  { %s300_s29 = scalar_lea.hbm %s416_s3, 256 }
  0xdf   :  { %p301_p5 = scmp.ne.s32.totalorder %s416_s3, %s300_s29  ;;  %p304_p6 = scmp.lt.u32.totalorder %s300_s29, %s416_s3 }
  0xe1   :  { %p306_p7 = pnand %p304_p6, %p301_p5 }
  0xe3   :  { %309 = shalt.err (!%p306_p7)
}
  0xe4   :  { %s338_s9 = smov 128   ;;  %s339_s10 = smov 8   ;;  %195 = vxpose.xlu1.b32.end [2/2] (short) (narrow) %v281_v4, 8  ;;  %187 = vrot.lane.b32.xlu0 %v281_v4, %s336_s2  ;;  %vm191_vm2 = vcmask 31744   ;;  %vm226_vm3 = vcmask 125952  }
  0xe5   :  { %239 = dma.vmem_to_hbm [thread:$0]  %s234_s26, 256, %s416_s3, [#allocation3], %s338_s9, %s338_s9, %s339_s10  }
  0xe6   :  { %s340_s17 = smov [#allocation4]  }
  0xe7   :  { %s248_s18 = sshll.u32 %s340_s17, 4  ;;  %s249_s18 = int_to_ptr.vmem [resolvable:$true] %s248_s18 }
  0xe8   :  { %s310_s3 = scalar_lea.vmem %s249_s18, 64  ;;  %p315_p9 = scmp.lt.s32.totalorder %s249_s18, %s249_s18 }
  0xe9   :  { %p311_p8 = scmp.ne.s32.totalorder %s249_s18, %s310_s3  ;;  %p316_p10 = scmp.lt.s32.totalorder %s310_s3, %s310_s3 }
  0xeb   :  { %p317_p11 = por %p316_p10, %p315_p9 }
  0xed   :  { %p318_p12 = pnand %p317_p11, %p311_p8 }
 0x14c   :  { %v186_v8 = vpop.permute.xlu0 %185 }
 0x14d   :  { %192 = vst.msk [vmem:[%s417_s4] sm:$0xff] %vm191_vm2, %v186_v8 }
 0x156   :  { %v188_v9 = vpop.permute.xlu0 %187 }
 0x157   :  { %193 = vst.msk [vmem:[%s417_s4 + $0x8] sm:$0xff] %vm191_vm2, %v188_v9 }
 0x160   :  { %v210_v10 = vpop.trf.xlu1 }
 0x161   :  { %227 = vst.msk [vmem:[#allocation4] sm:$0xf] %vm226_vm3, %v210_v10 }
 0x162   :  { %321 = shalt.err (!%p318_p12)
}
 0x163   :  { %s322_s21 = scalar_lea.hbm %s418_s5, 64 }
 0x164   :  { %p323_p13 = scmp.ne.s32.totalorder %s418_s5, %s322_s21  ;;  %p326_p0 = scmp.lt.u32.totalorder %s322_s21, %s418_s5 }
 0x166   :  { %p328_p1 = pnand %p326_p0, %p323_p13 }
 0x168   :  { %331 = shalt.err (!%p328_p1)
}
 0x169   :  { %251 = dma.vmem_to_hbm [thread:$0]  %s249_s18, 64, %s418_s5, [#allocation5]  }
 0x16a   :  { %332 = dma.done.wait [#allocation3], 256  }
 0x16b   :  { %333 = vsyncadd [#allocation3], 4294967040 }
 0x16c   :  { %334 = dma.done.wait [#allocation5], 64  }
 0x16d   :  { %335 = vsyncadd [#allocation5], 4294967232 }
 0x16e   :  { %260 = vsyncpa [#allocation3], 1 }
 0x16f   :  { %261 = vsyncpa [#allocation5], 1 }

</bundles_post_ra>
